<compile_context>
chip_gen: v7x
topology: tpu7x:2x2x1
jax: 0.10.0
libtpu: 0.0.40
codegen_flags: <defaults>
</compile_context>

<pallas_src>
import jax
import jax.numpy as jnp
from jax import lax
from jax.experimental import pallas as pl
from jax.experimental.pallas import tpu as pltpu


def _liresconv_kernel(x_ref, w_ref, b_ref, su_ref, sd_ref, o_ref):
    # x_ref : (N, H, WC)          packed input, lane dim = W*C (128 lanes)
    # w_ref : (depth, WC, 3*WC)   fused per-layer banded weights [band_up | band_mid | band_dn]
    # b_ref : (depth, 1, WC)      packed effective bias
    # su_ref: (M, M)              block-diag shift:  (su @ y)[r] = y[r-1] within an image, else 0
    # sd_ref: (M, M)              block-diag shift:  (sd @ y)[r] = y[r+1] within an image, else 0
    # o_ref : (N, H, WC)          packed output
    N, H, WC = x_ref.shape
    depth = w_ref.shape[0]
    M = N * H

    s_up = su_ref[...]                       # loop-invariant, loaded once
    s_dn = sd_ref[...]
    x0 = x_ref[...].reshape(M, WC)           # value reshape (free), activation lives in vregs

    def layer(d, x):
        w = w_ref[d]                         # (WC, 3*WC)
        b = b_ref[d]                         # (1, WC)
        # One wide MXU pass per layer: all three ky taps at once, aligned LHS.
        y = jnp.dot(x, w, preferred_element_type=jnp.float32)          # (M, 3*WC)
        y_up = y[:, :WC]                     # contribution of input row r   to output row r+1
        y_md = y[:, WC:2 * WC]               # contribution of input row r   to output row r
        y_dn = y[:, 2 * WC:]                 # contribution of input row r   to output row r-1
        acc = y_md
        acc = acc + jnp.dot(s_up, y_up, preferred_element_type=jnp.float32)   # y_up[r-1]
        acc = acc + jnp.dot(s_dn, y_dn, preferred_element_type=jnp.float32)   # y_dn[r+1]
        return jnp.maximum(acc + b, 0.0)     # activation = ReLU

    x_out = lax.fori_loop(0, depth, layer, x0, unroll=True)
    o_ref[...] = x_out.reshape(N, H, WC).astype(o_ref.dtype)


def pack_liresconv_params(weights, gamma, bias, running_mean, img_w):
    """One-time packing of LiResConv parameters into kernel operands (eval branch).

    w_cat[d, w_in*C + ci, ky*WC + w_out*C + co] = W_eff[d, co, ci, ky, kx]
        with kx = w_in - w_out + 1 (zero outside [0,3) -> W-direction zero padding).
    """
    depth, width = bias.shape
    scale = depth ** (-0.5)

    eye = jnp.eye(width, dtype=jnp.float32)
    identity = jnp.zeros((width, width, 3, 3), jnp.float32).at[:, :, 1, 1].set(eye)
    w_eff = identity[None] + weights.astype(jnp.float32) * gamma.astype(jnp.float32) * scale
    b_eff = (bias - running_mean).astype(jnp.float32)                  # (depth, width)

    WC = img_w * width
    # T[d, ky, kx, ci, co] = w_eff[d, co, ci, ky, kx]
    T = jnp.transpose(w_eff, (0, 3, 4, 2, 1))
    # S[kx, w_in, w_out] = 1  iff  w_in == w_out + kx - 1   (kx shift + W zero-pad)
    S = jnp.stack([jnp.eye(img_w, k=1 - kx, dtype=jnp.float32) for kx in range(3)])
    band = jnp.einsum('kuv,dykio->dyuivo', S, T).reshape(depth, 3, WC, WC)
    # Concatenate the three ky bands along the output axis -> (depth, WC, 3*WC)
    w_cat = jnp.transpose(band, (0, 2, 1, 3)).reshape(depth, WC, 3 * WC)
    b_k = jnp.tile(b_eff, (1, img_w)).reshape(depth, 1, WC)            # (depth, 1, WC)
    return w_cat, b_k


@jax.jit
def liresconv_apply(x_nchw, w_cat, b_k):
    """Per-call forward: layout plumbing + one pallas_call. x_nchw: (N, C, H, W)."""
    N, C, H, Wimg = x_nchw.shape
    depth = w_cat.shape[0]
    WC = Wimg * C
    M = N * H

    # NCHW -> lane-dense packed (N, H, W*C) with lane index = w*C + c
    x_p = jnp.transpose(x_nchw.astype(jnp.float32), (0, 2, 3, 1)).reshape(N, H, WC)

    # Block-diagonal (per image) +/-1 row-shift matrices over the flattened N*H row axis;
    # the zero rows at image boundaries implement the H-direction zero padding exactly.
    s_up = jnp.kron(jnp.eye(N, dtype=jnp.float32), jnp.eye(H, k=-1, dtype=jnp.float32))
    s_dn = jnp.kron(jnp.eye(N, dtype=jnp.float32), jnp.eye(H, k=1, dtype=jnp.float32))

    out_p = pl.pallas_call(
        _liresconv_kernel,
        out_shape=jax.ShapeDtypeStruct((N, H, WC), jnp.float32),
        grid_spec=pltpu.PrefetchScalarGridSpec(
            num_scalar_prefetch=0,
            grid=(1,),                                                 # depth folded inside
            in_specs=[
                pl.BlockSpec((N, H, WC), lambda i: (0, 0, 0)),
                pl.BlockSpec((depth, WC, 3 * WC), lambda i: (0, 0, 0)),
                pl.BlockSpec((depth, 1, WC), lambda i: (0, 0, 0)),
                pl.BlockSpec((M, M), lambda i: (0, 0)),
                pl.BlockSpec((M, M), lambda i: (0, 0)),
            ],
            out_specs=pl.BlockSpec((N, H, WC), lambda i: (0, 0, 0)),
        ),
        compiler_params=pltpu.CompilerParams(
            dimension_semantics=("arbitrary",),
            vmem_limit_bytes=32 * 1024 * 1024,
        ),
    )(x_p, w_cat, b_k, s_up, s_dn)

    # back to NCHW
    return jnp.transpose(out_p.reshape(N, H, Wimg, C), (0, 3, 1, 2))


def _reference_forward(x_nchw, weights, gamma, bias, running_mean):
    """Pure-JAX reference matching F.conv2d(padding=1) + bias + ReLU per layer."""
    depth, width = bias.shape
    scale = depth ** (-0.5)
    eye = jnp.eye(width, dtype=jnp.float32)
    identity = jnp.zeros((width, width, 3, 3), jnp.float32).at[:, :, 1, 1].set(eye)
    w_eff = identity[None] + weights * gamma * scale
    b_eff = bias - running_mean
    x = x_nchw.astype(jnp.float32)
    for d in range(depth):
        x = lax.conv_general_dilated(
            x, w_eff[d], window_strides=(1, 1), padding="SAME",
            dimension_numbers=("NCHW", "OIHW", "NCHW"))
        x = x + b_eff[d][None, :, None, None]
        x = jnp.maximum(x, 0.0)
    return x


if __name__ == "__main__":
    # Small shapes consistent with the module: width=8 channels, depth=3 layers,
    # batch=2, spatial 16x16  (W * C = 128 -> exactly one lane-dense vreg row).
    depth, width = 3, 8
    N, H, W = 2, 16, 16

    key = jax.random.PRNGKey(0)
    k_x, k_w, k_b = jax.random.split(key, 3)

    x = jax.random.normal(k_x, (N, width, H, W), jnp.float32)                    # NCHW
    weights = jax.random.normal(k_w, (depth, width, width, 3, 3), jnp.float32) / (width * 9)
    gamma = jnp.ones((depth, width, 1, 1, 1), jnp.float32)
    bias = 0.1 * jax.random.normal(k_b, (depth, width), jnp.float32)
    running_mean = jnp.zeros((depth, width), jnp.float32)

    # Pack the (static-at-eval) parameters once, outside the per-call path.
    w_cat, b_k = pack_liresconv_params(weights, gamma, bias, running_mean, W)

    out = liresconv_apply(x, w_cat, b_k)
    out = jax.block_until_ready(out)

    ref = _reference_forward(x, weights, gamma, bias, running_mean)
    assert out.shape == ref.shape == (N, width, H, W)
    assert jnp.allclose(out, ref, rtol=1e-4, atol=1e-4), float(jnp.max(jnp.abs(out - ref)))

    print("KERNEL_OK")
</pallas_src>

<mosaic_0001>
module attributes {stable_mosaic.version = 11 : i64} {
  func.func @_liresconv_kernel(%arg0: i32, %arg1: memref<2x16x128xf32, #tpu.memory_space<vmem>>, %arg2: memref<3x128x384xf32, #tpu.memory_space<vmem>>, %arg3: memref<3x1x128xf32, #tpu.memory_space<vmem>>, %arg4: memref<32x32xf32, #tpu.memory_space<vmem>>, %arg5: memref<32x32xf32, #tpu.memory_space<vmem>>, %arg6: memref<2x16x128xf32, #tpu.memory_space<vmem>>) attributes {dimension_semantics = [#tpu.dimension_semantics<arbitrary>], iteration_bounds = array<i64: 1>, scalar_prefetch = 0 : i64, scratch_operands = 0 : i64, tpu.core_type = #tpu.core_type<tc>, window_params = [{pipeline_mode = #tpu.pipeline_mode<synchronous>, transform_indices = @transform_0, window_bounds = array<i64: 2, 16, 128>}, {pipeline_mode = #tpu.pipeline_mode<synchronous>, transform_indices = @transform_1, window_bounds = array<i64: 3, 128, 384>}, {pipeline_mode = #tpu.pipeline_mode<synchronous>, transform_indices = @transform_2, window_bounds = array<i64: 3, 1, 128>}, {pipeline_mode = #tpu.pipeline_mode<synchronous>, transform_indices = @transform_3, window_bounds = array<i64: 32, 32>}, {pipeline_mode = #tpu.pipeline_mode<synchronous>, transform_indices = @transform_4, window_bounds = array<i64: 32, 32>}, {pipeline_mode = #tpu.pipeline_mode<synchronous>, transform_indices = @transform_5, window_bounds = array<i64: 2, 16, 128>}]} {
    %c0 = arith.constant 0 : index
    %c0_0 = arith.constant 0 : index
    %0 = vector.load %arg4[%c0, %c0_0] : memref<32x32xf32, #tpu.memory_space<vmem>>, vector<32x32xf32>
    %c0_1 = arith.constant 0 : index
    %c0_2 = arith.constant 0 : index
    %1 = vector.load %arg5[%c0_1, %c0_2] : memref<32x32xf32, #tpu.memory_space<vmem>>, vector<32x32xf32>
    %c0_3 = arith.constant 0 : index
    %c0_4 = arith.constant 0 : index
    %c0_5 = arith.constant 0 : index
    %2 = vector.load %arg1[%c0_3, %c0_4, %c0_5] : memref<2x16x128xf32, #tpu.memory_space<vmem>>, vector<2x16x128xf32>
    %3 = vector.shape_cast %2 : vector<2x16x128xf32> to vector<32x128xf32>
    %c0_i32 = arith.constant 0 : i32
    %4 = arith.index_cast %c0_i32 : i32 to index
    %c0_6 = arith.constant 0 : index
    %c0_7 = arith.constant 0 : index
    %5 = vector.load %arg2[%4, %c0_6, %c0_7] : memref<3x128x384xf32, #tpu.memory_space<vmem>>, vector<1x128x384xf32>
    %6 = vector.shape_cast %5 : vector<1x128x384xf32> to vector<128x384xf32>
    %7 = arith.index_cast %c0_i32 : i32 to index
    %c0_8 = arith.constant 0 : index
    %c0_9 = arith.constant 0 : index
    %8 = vector.load %arg3[%7, %c0_8, %c0_9] : memref<3x1x128xf32, #tpu.memory_space<vmem>>, vector<1x1x128xf32>
    %9 = vector.shape_cast %8 : vector<1x1x128xf32> to vector<1x128xf32>
    %cst = arith.constant dense<0.000000e+00> : vector<32x384xf32>
    %10 = tpu.matmul %3, %6, %cst {dimension_numbers = #tpu.dot_dimension_numbers<[1], [0], [0], [1], [0, 0, 1, 1], [], []>} : vector<32x128xf32>, vector<128x384xf32>, vector<32x384xf32> -> vector<32x384xf32>
    %11 = vector.extract_strided_slice %10 {offsets = [0, 0], sizes = [32, 128], strides = [1, 1]} : vector<32x384xf32> to vector<32x128xf32>
    %12 = vector.extract_strided_slice %10 {offsets = [0, 128], sizes = [32, 128], strides = [1, 1]} : vector<32x384xf32> to vector<32x128xf32>
    %13 = vector.extract_strided_slice %10 {offsets = [0, 256], sizes = [32, 128], strides = [1, 1]} : vector<32x384xf32> to vector<32x128xf32>
    %cst_10 = arith.constant dense<0.000000e+00> : vector<32x128xf32>
    %14 = tpu.matmul %0, %11, %cst_10 {dimension_numbers = #tpu.dot_dimension_numbers<[1], [0], [0], [1], [0, 0, 1, 1], [], []>} : vector<32x32xf32>, vector<32x128xf32>, vector<32x128xf32> -> vector<32x128xf32>
    %15 = arith.addf %12, %14 : vector<32x128xf32>
    %cst_11 = arith.constant dense<0.000000e+00> : vector<32x128xf32>
    %16 = tpu.matmul %1, %13, %cst_11 {dimension_numbers = #tpu.dot_dimension_numbers<[1], [0], [0], [1], [0, 0, 1, 1], [], []>} : vector<32x32xf32>, vector<32x128xf32>, vector<32x128xf32> -> vector<32x128xf32>
    %17 = arith.addf %15, %16 : vector<32x128xf32>
    %18 = vector.broadcast %9 : vector<1x128xf32> to vector<32x128xf32>
    %19 = arith.addf %17, %18 : vector<32x128xf32>
    %cst_12 = arith.constant 0.000000e+00 : f32
    %20 = vector.broadcast %cst_12 : f32 to vector<32x128xf32>
    %21 = arith.maximumf %19, %20 : vector<32x128xf32>
    %c1_i32 = arith.constant 1 : i32
    %22 = arith.index_cast %c1_i32 : i32 to index
    %c0_13 = arith.constant 0 : index
    %c0_14 = arith.constant 0 : index
    %23 = vector.load %arg2[%22, %c0_13, %c0_14] : memref<3x128x384xf32, #tpu.memory_space<vmem>>, vector<1x128x384xf32>
    %24 = vector.shape_cast %23 : vector<1x128x384xf32> to vector<128x384xf32>
    %25 = arith.index_cast %c1_i32 : i32 to index
    %c0_15 = arith.constant 0 : index
    %c0_16 = arith.constant 0 : index
    %26 = vector.load %arg3[%25, %c0_15, %c0_16] : memref<3x1x128xf32, #tpu.memory_space<vmem>>, vector<1x1x128xf32>
    %27 = vector.shape_cast %26 : vector<1x1x128xf32> to vector<1x128xf32>
    %cst_17 = arith.constant dense<0.000000e+00> : vector<32x384xf32>
    %28 = tpu.matmul %21, %24, %cst_17 {dimension_numbers = #tpu.dot_dimension_numbers<[1], [0], [0], [1], [0, 0, 1, 1], [], []>} : vector<32x128xf32>, vector<128x384xf32>, vector<32x384xf32> -> vector<32x384xf32>
    %29 = vector.extract_strided_slice %28 {offsets = [0, 0], sizes = [32, 128], strides = [1, 1]} : vector<32x384xf32> to vector<32x128xf32>
    %30 = vector.extract_strided_slice %28 {offsets = [0, 128], sizes = [32, 128], strides = [1, 1]} : vector<32x384xf32> to vector<32x128xf32>
    %31 = vector.extract_strided_slice %28 {offsets = [0, 256], sizes = [32, 128], strides = [1, 1]} : vector<32x384xf32> to vector<32x128xf32>
    %cst_18 = arith.constant dense<0.000000e+00> : vector<32x128xf32>
    %32 = tpu.matmul %0, %29, %cst_18 {dimension_numbers = #tpu.dot_dimension_numbers<[1], [0], [0], [1], [0, 0, 1, 1], [], []>} : vector<32x32xf32>, vector<32x128xf32>, vector<32x128xf32> -> vector<32x128xf32>
    %33 = arith.addf %30, %32 : vector<32x128xf32>
    %cst_19 = arith.constant dense<0.000000e+00> : vector<32x128xf32>
    %34 = tpu.matmul %1, %31, %cst_19 {dimension_numbers = #tpu.dot_dimension_numbers<[1], [0], [0], [1], [0, 0, 1, 1], [], []>} : vector<32x32xf32>, vector<32x128xf32>, vector<32x128xf32> -> vector<32x128xf32>
    %35 = arith.addf %33, %34 : vector<32x128xf32>
    %36 = vector.broadcast %27 : vector<1x128xf32> to vector<32x128xf32>
    %37 = arith.addf %35, %36 : vector<32x128xf32>
    %cst_20 = arith.constant 0.000000e+00 : f32
    %38 = vector.broadcast %cst_20 : f32 to vector<32x128xf32>
    %39 = arith.maximumf %37, %38 : vector<32x128xf32>
    %c2_i32 = arith.constant 2 : i32
    %40 = arith.index_cast %c2_i32 : i32 to index
    %c0_21 = arith.constant 0 : index
    %c0_22 = arith.constant 0 : index
    %41 = vector.load %arg2[%40, %c0_21, %c0_22] : memref<3x128x384xf32, #tpu.memory_space<vmem>>, vector<1x128x384xf32>
    %42 = vector.shape_cast %41 : vector<1x128x384xf32> to vector<128x384xf32>
    %43 = arith.index_cast %c2_i32 : i32 to index
    %c0_23 = arith.constant 0 : index
    %c0_24 = arith.constant 0 : index
    %44 = vector.load %arg3[%43, %c0_23, %c0_24] : memref<3x1x128xf32, #tpu.memory_space<vmem>>, vector<1x1x128xf32>
    %45 = vector.shape_cast %44 : vector<1x1x128xf32> to vector<1x128xf32>
    %cst_25 = arith.constant dense<0.000000e+00> : vector<32x384xf32>
    %46 = tpu.matmul %39, %42, %cst_25 {dimension_numbers = #tpu.dot_dimension_numbers<[1], [0], [0], [1], [0, 0, 1, 1], [], []>} : vector<32x128xf32>, vector<128x384xf32>, vector<32x384xf32> -> vector<32x384xf32>
    %47 = vector.extract_strided_slice %46 {offsets = [0, 0], sizes = [32, 128], strides = [1, 1]} : vector<32x384xf32> to vector<32x128xf32>
    %48 = vector.extract_strided_slice %46 {offsets = [0, 128], sizes = [32, 128], strides = [1, 1]} : vector<32x384xf32> to vector<32x128xf32>
    %49 = vector.extract_strided_slice %46 {offsets = [0, 256], sizes = [32, 128], strides = [1, 1]} : vector<32x384xf32> to vector<32x128xf32>
    %cst_26 = arith.constant dense<0.000000e+00> : vector<32x128xf32>
    %50 = tpu.matmul %0, %47, %cst_26 {dimension_numbers = #tpu.dot_dimension_numbers<[1], [0], [0], [1], [0, 0, 1, 1], [], []>} : vector<32x32xf32>, vector<32x128xf32>, vector<32x128xf32> -> vector<32x128xf32>
    %51 = arith.addf %48, %50 : vector<32x128xf32>
    %cst_27 = arith.constant dense<0.000000e+00> : vector<32x128xf32>
    %52 = tpu.matmul %1, %49, %cst_27 {dimension_numbers = #tpu.dot_dimension_numbers<[1], [0], [0], [1], [0, 0, 1, 1], [], []>} : vector<32x32xf32>, vector<32x128xf32>, vector<32x128xf32> -> vector<32x128xf32>
    %53 = arith.addf %51, %52 : vector<32x128xf32>
    %54 = vector.broadcast %45 : vector<1x128xf32> to vector<32x128xf32>
    %55 = arith.addf %53, %54 : vector<32x128xf32>
    %cst_28 = arith.constant 0.000000e+00 : f32
    %56 = vector.broadcast %cst_28 : f32 to vector<32x128xf32>
    %57 = arith.maximumf %55, %56 : vector<32x128xf32>
    %c3_i32 = arith.constant 3 : i32
    %58 = vector.shape_cast %57 : vector<32x128xf32> to vector<2x16x128xf32>
    %c0_29 = arith.constant 0 : index
    %c0_30 = arith.constant 0 : index
    %c0_31 = arith.constant 0 : index
    %59 = vector.load %arg6[%c0_29, %c0_30, %c0_31] : memref<2x16x128xf32, #tpu.memory_space<vmem>>, vector<2x16x128xf32>
    tpu.vector_store %arg6[%c0_29, %c0_30, %c0_31], %58 {strides = array<i32>} : memref<2x16x128xf32, #tpu.memory_space<vmem>>, vector<2x16x128xf32>,
    return
  }
  func.func @transform_0(%arg0: i32) -> (i32, i32, i32) {
    %c0_i32 = arith.constant 0 : i32
    %c0_i32_0 = arith.constant 0 : i32
    %c0_i32_1 = arith.constant 0 : i32
    %c0_i32_2 = arith.constant 0 : i32
    return %c0_i32, %c0_i32_0, %c0_i32_1 : i32, i32, i32
  }
  func.func @transform_1(%arg0: i32) -> (i32, i32, i32) {
    %c0_i32 = arith.constant 0 : i32
    %c0_i32_0 = arith.constant 0 : i32
    %c0_i32_1 = arith.constant 0 : i32
    %c0_i32_2 = arith.constant 0 : i32
    return %c0_i32, %c0_i32_0, %c0_i32_1 : i32, i32, i32
  }
  func.func @transform_2(%arg0: i32) -> (i32, i32, i32) {
    %c0_i32 = arith.constant 0 : i32
    %c0_i32_0 = arith.constant 0 : i32
    %c0_i32_1 = arith.constant 0 : i32
    %c0_i32_2 = arith.constant 0 : i32
    return %c0_i32, %c0_i32_0, %c0_i32_1 : i32, i32, i32
  }
  func.func @transform_3(%arg0: i32) -> (i32, i32) {
    %c0_i32 = arith.constant 0 : i32
    %c0_i32_0 = arith.constant 0 : i32
    %c0_i32_1 = arith.constant 0 : i32
    return %c0_i32, %c0_i32_0 : i32, i32
  }
  func.func @transform_4(%arg0: i32) -> (i32, i32) {
    %c0_i32 = arith.constant 0 : i32
    %c0_i32_0 = arith.constant 0 : i32
    %c0_i32_1 = arith.constant 0 : i32
    return %c0_i32, %c0_i32_0 : i32, i32
  }
  func.func @transform_5(%arg0: i32) -> (i32, i32, i32) {
    %c0_i32 = arith.constant 0 : i32
    %c0_i32_0 = arith.constant 0 : i32
    %c0_i32_1 = arith.constant 0 : i32
    %c0_i32_2 = arith.constant 0 : i32
    return %c0_i32, %c0_i32_0, %c0_i32_1 : i32, i32, i32
  }
}

</mosaic_0001>

<bundles_post_ra>
// kernel: liresconv_apply.1
= control target key start
LH: loop header
LB: loop body
LE: loop exit
PB: predicated region body
PF: predicated region fallthrough
CT: control target
= control target key end

     0   :  { %v1990_v3 = vmov 0.0   ;;  %vm255_vm0 = vcmask 261120   ;;  %s2610_s1 = inlined_call_operand.vmem [shape: f32[3,128,384], index: 1, kind: input, shape index: {}]   ;;  %s2611_s0 = inlined_call_operand.vmem [shape: f32[2,16,128], index: 0, kind: input, shape index: {}]   ;;  %s2612_s3 = inlined_call_operand.vmem [shape: f32[32,32], index: 3, kind: input, shape index: {}]   ;;  %s2613_s4 = inlined_call_operand.vmem [shape: f32[32,32], index: 4, kind: input, shape index: {}]   ;;  %s2614_s2 = inlined_call_operand.vmem [shape: f32[3,1,128], index: 2, kind: input, shape index: {}]   ;;  %s2615_s5 = inlined_call_operand.vmem [shape: f32[2,16,128], index: 5, kind: output, shape index: {}]  }
   0x1   :  { %v33_v0 = vld [vmem:[%s2610_s1 + $0x8] sm:$0xff]  ;;  %v36_v1 = vld [vmem:[%s2610_s1 + $0x20] sm:$0xff]  ;;  %v34_v2 = vld [vmem:[%s2610_s1 + $0x10] sm:$0xff]  ;;  %145 = vmatprep.mubr.f32.mxu0 %v1990_v3 }
   0x2   :  { %v1745_v4 = vpack.c.bf16 %v36_v1, %v33_v0  ;;  %v37_v5 = vld [vmem:[%s2610_s1 + $0x28] sm:$0xff]  ;;  %v32_v6 = vld [vmem:[%s2610_s1] sm:$0xff]  ;;  %v35_v7 = vld [vmem:[%s2610_s1 + $0x18] sm:$0xff] }
   0x3   :  { %v1777_v8 = vpack.c.bf16 %v37_v5, %v34_v2  ;;  %v1747_v9 = vpack.c.bf16 %v35_v7, %v32_v6  ;;  %v39_v10 = vld [vmem:[%s2610_s1 + $0x38] sm:$0xff]  ;;  %v42_v11 = vld [vmem:[%s2610_s1 + $0x50] sm:$0xff]  ;;  %v40_v12 = vld [vmem:[%s2610_s1 + $0x40] sm:$0xff] }
   0x4   :  { %1746 = vmatprep.subr.bf16.mxu0 %v1745_v4  ;;  %v1749_v13 = vpack.c.bf16 %v42_v11, %v39_v10  ;;  %v43_v14 = vld [vmem:[%s2610_s1 + $0x58] sm:$0xff]  ;;  %v38_v15 = vld [vmem:[%s2610_s1 + $0x30] sm:$0xff]  ;;  %v41_v16 = vld [vmem:[%s2610_s1 + $0x48] sm:$0xff] }
   0x5   :  { %1778 = vmatprep.subr.bf16.mxu1 %v1777_v8  ;;  %1748 = vmatpush1.bf16.msra.mxu0 %v1747_v9  ;;  %v1781_v17 = vpack.c.bf16 %v43_v14, %v40_v12  ;;  %v1751_v18 = vpack.c.bf16 %v41_v16, %v38_v15  ;;  %v45_v19 = vld [vmem:[%s2610_s1 + $0x68] sm:$0xff]  ;;  %v48_v20 = vld [vmem:[%s2610_s1 + $0x80] sm:$0xff]  ;;  %v46_v21 = vld [vmem:[%s2610_s1 + $0x70] sm:$0xff] }
   0x6   :  { %1780 = vmatpush3.bf16.msra.mxu1 %v1777_v8  ;;  %1750 = vmatprep.subr.bf16.mxu0 %v1749_v13  ;;  %v1753_v22 = vpack.c.bf16 %v48_v20, %v45_v19  ;;  %v49_v23 = vld [vmem:[%s2610_s1 + $0x88] sm:$0xff]  ;;  %v44_v24 = vld [vmem:[%s2610_s1 + $0x60] sm:$0xff]  ;;  %v47_v25 = vld [vmem:[%s2610_s1 + $0x78] sm:$0xff] }
   0x7   :  { %1782 = vmatprep.subr.bf16.mxu1 %v1781_v17  ;;  %v1785_v26 = vpack.c.bf16 %v49_v23, %v46_v21  ;;  %v51_v27 = vld [vmem:[%s2610_s1 + $0x98] sm:$0xff]  ;;  %v54_v28 = vld [vmem:[%s2610_s1 + $0xb0] sm:$0xff]  ;;  %v52_v29 = vld [vmem:[%s2610_s1 + $0xa0] sm:$0xff]  ;;  %v1755_v31 = vpack.c.bf16 %v47_v25, %v44_v24 }
   0x8   :  { %v55_v30 = vld [vmem:[%s2610_s1 + $0xb8] sm:$0xff]  ;;  %v1757_v32 = vpack.c.bf16 %v54_v28, %v51_v27  ;;  %v50_v33 = vld [vmem:[%s2610_s1 + $0x90] sm:$0xff]  ;;  %v53_v34 = vld [vmem:[%s2610_s1 + $0xa8] sm:$0xff] }
   0x9   :  { %1752 = vmatpush1.bf16.msra.mxu0 %v1751_v18  ;;  %v1789_v35 = vpack.c.bf16 %v55_v30, %v52_v29  ;;  %v57_v36 = vld [vmem:[%s2610_s1 + $0xc8] sm:$0xff]  ;;  %v60_v37 = vld [vmem:[%s2610_s1 + $0xe0] sm:$0xff]  ;;  %v58_v38 = vld [vmem:[%s2610_s1 + $0xd0] sm:$0xff]  ;;  %v1759_v40 = vpack.c.bf16 %v53_v34, %v50_v33 }
   0xa   :  { %1784 = vmatpush3.bf16.msra.mxu1 %v1781_v17  ;;  %1754 = vmatprep.subr.bf16.mxu0 %v1753_v22  ;;  %v61_v39 = vld [vmem:[%s2610_s1 + $0xe8] sm:$0xff]  ;;  %v1761_v41 = vpack.c.bf16 %v60_v37, %v57_v36  ;;  %v56_v42 = vld [vmem:[%s2610_s1 + $0xc0] sm:$0xff]  ;;  %v59_v43 = vld [vmem:[%s2610_s1 + $0xd8] sm:$0xff] }
   0xb   :  { %1786 = vmatprep.subr.bf16.mxu1 %v1785_v26  ;;  %v1793_v44 = vpack.c.bf16 %v61_v39, %v58_v38  ;;  %v63_v45 = vld [vmem:[%s2610_s1 + $0xf8] sm:$0xff]  ;;  %v66_v46 = vld [vmem:[%s2610_s1 + $0x110] sm:$0xff]  ;;  %v64_v47 = vld [vmem:[%s2610_s1 + $0x100] sm:$0xff]  ;;  %v1763_v49 = vpack.c.bf16 %v59_v43, %v56_v42 }
   0xc   :  { %v67_v48 = vld [vmem:[%s2610_s1 + $0x118] sm:$0xff]  ;;  %v1765_v50 = vpack.c.bf16 %v66_v46, %v63_v45  ;;  %v62_v51 = vld [vmem:[%s2610_s1 + $0xf0] sm:$0xff]  ;;  %v65_v52 = vld [vmem:[%s2610_s1 + $0x108] sm:$0xff] }
   0xd   :  { %1756 = vmatpush1.bf16.msra.mxu0 %v1755_v31  ;;  %v28_v53 = vld [vmem:[%s2611_s0] sm:$0xff]  ;;  %v1797_v54 = vpack.c.bf16 %v67_v48, %v64_v47  ;;  %v69_v55 = vld [vmem:[%s2610_s1 + $0x128] sm:$0xff]  ;;  %v70_v57 = vld [vmem:[%s2610_s1 + $0x130] sm:$0xff]  ;;  %v1767_v59 = vpack.c.bf16 %v65_v52, %v62_v51 }
   0xe   :  { %1788 = vmatpush3.bf16.msra.mxu1 %v1785_v26  ;;  %1758 = vmatprep.subr.bf16.mxu0 %v1757_v32  ;;  %v72_v56 = vld [vmem:[%s2610_s1 + $0x140] sm:$0xff]  ;;  %v73_v58 = vld [vmem:[%s2610_s1 + $0x148] sm:$0xff]  ;;  %v71_v62 = vld [vmem:[%s2610_s1 + $0x138] sm:$0xff] }
   0xf   :  { %1790 = vmatprep.subr.bf16.mxu1 %v1789_v35  ;;  %1579 = vmatprep.mubr.f32.mxu1 %v28_v53  ;;  %v1769_v60 = vpack.c.bf16 %v72_v56, %v69_v55  ;;  %v68_v61 = vld [vmem:[%s2610_s1 + $0x120] sm:$0xff]  ;;  %v1801_v63 = vpack.c.bf16 %v73_v58, %v70_v57  ;;  %v75_v0 = vld [vmem:[%s2610_s1 + $0x158] sm:$0xff]  ;;  %v78_v1 = vld [vmem:[%s2610_s1 + $0x170] sm:$0xff] }
  0x10   :  { %v76_v2 = vld [vmem:[%s2610_s1 + $0x160] sm:$0xff]  ;;  %v79_v4 = vld [vmem:[%s2610_s1 + $0x178] sm:$0xff]  ;;  %v1771_v5 = vpack.c.bf16 %v71_v62, %v68_v61  ;;  %v1773_v6 = vpack.c.bf16 %v78_v1, %v75_v0  ;;  %v74_v7 = vld [vmem:[%s2610_s1 + $0x150] sm:$0xff] }
  0x11   :  { %1760 = vmatpush1.bf16.msra.mxu0 %v1759_v40  ;;  %v77_v8 = vld [vmem:[%s2610_s1 + $0x168] sm:$0xff]  ;;  %v1805_v9 = vpack.c.bf16 %v79_v4, %v76_v2  ;;  %v30_v12 = vld [vmem:[%s2611_s0 + $0x10] sm:$0xff]  ;;  %v31_v13 = vld [vmem:[%s2611_s0 + $0x18] sm:$0xff] }
  0x12   :  { %1792 = vmatpush3.bf16.msra.mxu1 %v1789_v35  ;;  %1762 = vmatprep.subr.bf16.mxu0 %v1761_v41  ;;  %v1775_v10 = vpack.c.bf16 %v77_v8, %v74_v7  ;;  %v29_v11 = vld [vmem:[%s2611_s0 + $0x8] sm:$0xff]  ;;  %v2184_v14 = vld [vmem:[%s2612_s3] sm:$0xff]  ;;  %v1325_v22 = vld [vmem:[%s2610_s1 + $0x190] sm:$0xff] }
  0x13   :  { %1794 = vmatprep.subr.bf16.mxu1 %v1793_v44  ;;  %v2191_v15 = vld [vmem:[%s2613_s4] sm:$0xff]  ;;  %v1328_v23 = vld [vmem:[%s2610_s1 + $0x1a8] sm:$0xff]  ;;  %v1334_v32 = vld [vmem:[%s2610_s1 + $0x1d8] sm:$0xff] }
  0x14   :  { %v1857_v29 = vpack.c.bf16 %v1328_v23, %v1325_v22  ;;  %v1331_v31 = vld [vmem:[%s2610_s1 + $0x1c0] sm:$0xff]  ;;  %v2216_v34 = vld [vmem:[%s2613_s4 + $0x8] sm:$0xff]  ;;  %v2227_v37 = vld [vmem:[%s2613_s4 + $0x10] sm:$0xff] }
  0x15   :  { %1764 = vmatpush1.bf16.msra.mxu0 %v1763_v49  ;;  %v1324_v35 = vld [vmem:[%s2610_s1 + $0x188] sm:$0xff]  ;;  %v1327_v36 = vld [vmem:[%s2610_s1 + $0x1a0] sm:$0xff]  ;;  %v1861_v38 = vpack.c.bf16 %v1334_v32, %v1331_v31  ;;  %v1337_v40 = vld [vmem:[%s2610_s1 + $0x1f0] sm:$0xff] }
  0x16   :  { %1796 = vmatpush3.bf16.msra.mxu1 %v1793_v44  ;;  %1766 = vmatprep.subr.bf16.mxu0 %v1765_v50  ;;  %v1340_v41 = vld [vmem:[%s2610_s1 + $0x208] sm:$0xff]  ;;  %v1825_v44 = vpack.c.bf16 %v1327_v36, %v1324_v35  ;;  %v1323_v45 = vld [vmem:[%s2610_s1 + $0x180] sm:$0xff]  ;;  %v1326_v46 = vld [vmem:[%s2610_s1 + $0x198] sm:$0xff] }
  0x17   :  { %1798 = vmatprep.subr.bf16.mxu1 %v1797_v54  ;;  %v2250_v47 = vld [vmem:[%s2613_s4 + $0x18] sm:$0xff]  ;;  %v1333_v49 = vld [vmem:[%s2610_s1 + $0x1d0] sm:$0xff]  ;;  %v1865_v50 = vpack.c.bf16 %v1340_v41, %v1337_v40  ;;  %v2261_v51 = vld [vmem:[%s2612_s3 + $0x8] sm:$0xff]  ;;  %v1827_v52 = vpack.c.bf16 %v1326_v46, %v1323_v45 }
  0x18   :  { %v1330_v48 = vld [vmem:[%s2610_s1 + $0x1b8] sm:$0xff]  ;;  %v2272_v55 = vld [vmem:[%s2612_s3 + $0x10] sm:$0xff]  ;;  %v1332_v58 = vld [vmem:[%s2610_s1 + $0x1c8] sm:$0xff] }
  0x19   :  { %1768 = vmatpush1.bf16.msra.mxu0 %v1767_v59  ;;  %v1829_v56 = vpack.c.bf16 %v1333_v49, %v1330_v48  ;;  %v1329_v57 = vld [vmem:[%s2610_s1 + $0x1b0] sm:$0xff]  ;;  %v1336_v59 = vld [vmem:[%s2610_s1 + $0x1e8] sm:$0xff]  ;;  %v2295_v62 = vld [vmem:[%s2612_s3 + $0x18] sm:$0xff] }
  0x1a   :  { %1800 = vmatpush3.bf16.msra.mxu1 %v1797_v54  ;;  %1770 = vmatprep.subr.bf16.mxu0 %v1769_v60  ;;  %v1346_v54 = vld [vmem:[%s2610_s1 + $0x238] sm:$0xff]  ;;  %v1339_v60 = vld [vmem:[%s2610_s1 + $0x200] sm:$0xff]  ;;  %v1349_v0 = vld [vmem:[%s2610_s1 + $0x250] sm:$0xff] }
  0x1b   :  { %1802 = vmatprep.subr.bf16.mxu1 %v1801_v63  ;;  %v1352_v1 = vld [vmem:[%s2610_s1 + $0x268] sm:$0xff]  ;;  %v1833_v2 = vpack.c.bf16 %v1339_v60, %v1336_v59  ;;  %v1335_v4 = vld [vmem:[%s2610_s1 + $0x1e0] sm:$0xff]  ;;  %v1345_v7 = vld [vmem:[%s2610_s1 + $0x230] sm:$0xff] }
  0x1c   :  { %v1873_v8 = vpack.c.bf16 %v1352_v1, %v1349_v0  ;;  %v1347_v23 = vld [vmem:[%s2610_s1 + $0x240] sm:$0xff]  ;;  %v1356_v31 = vld [vmem:[%s2610_s1 + $0x288] sm:$0xff]  ;;  %v1362_v40 = vld [vmem:[%s2610_s1 + $0x2b8] sm:$0xff] }
  0x1d   :  { %1772 = vmatpush1.bf16.msra.mxu0 %v1771_v5  ;;  %v1338_v5 = vld [vmem:[%s2610_s1 + $0x1f8] sm:$0xff]  ;;  %v1360_v35 = vld [vmem:[%s2610_s1 + $0x2a8] sm:$0xff]  ;;  %v1363_v36 = vld [vmem:[%s2610_s1 + $0x2c0] sm:$0xff] }
  0x1e   :  { %1804 = vmatpush3.bf16.msra.mxu1 %v1801_v63  ;;  %1774 = vmatprep.subr.bf16.mxu0 %v1773_v6  ;;  %v1831_v63 = vpack.c.bf16 %v1332_v58, %v1329_v57  ;;  %v1342_v6 = vld [vmem:[%s2610_s1 + $0x218] sm:$0xff]  ;;  %v1361_v41 = vld [vmem:[%s2610_s1 + $0x2b0] sm:$0xff] }
  0x1f   :  { %1806 = vmatprep.subr.bf16.mxu1 %v1805_v9  ;;  %v1366_v46 = vld [vmem:[%s2610_s1 + $0x2d8] sm:$0xff]  ;;  %v1369_v48 = vld [vmem:[%s2610_s1 + $0x2f0] sm:$0xff] }
  0x20   :  { %v1853_v49 = vpack.c.bf16 %v1369_v48, %v1366_v46  ;;  %v1395_v48 = vld [vmem:[%s2610_s1 + $0x370] sm:$0xff] }
  0x21   :  { %1776 = vmatpush1.bf16.msra.mxu0 %v1775_v10  ;;  %v1355_v10 = vld [vmem:[%s2610_s1 + $0x280] sm:$0xff] }
  0x22   :  { %1808 = vmatpush3.bf16.msra.mxu1 %v1805_v9  ;;  %v1835_v9 = vpack.c.bf16 %v1338_v5, %v1335_v4  ;;  %v1322_v4 = vld [vmem:[%s2614_s2] ss:$0 sm:$0xff] }
  0x24   :  { %146 = vmatmul.mubr.f32.vlgmr.msra.gmra.mrb[0].mxu0 %v28_v53  ;;  %v1343_v53 = vld [vmem:[%s2610_s1 + $0x220] sm:$0xff] }
  0x25   :  { %1580 = vmatmul.mubr.f32.vlgmr.msra.gmra.mrb[0].mxu1 %v29_v11  ;;  %151 = vmatprep.mubr.f32.mxu0 %v1990_v3  ;;  %v1869_v61 = vpack.c.bf16 %v1346_v54, %v1343_v53  ;;  %v1367_v53 = vld [vmem:[%s2610_s1 + $0x2e0] sm:$0xff] }
  0x26   :  { %1582 = vmatprep.mubr.f32.mxu1 %v30_v12 }
  0x28   :  { %152 = vmatmul.mubr.f32.gmra.mrb[2].mxu0 %v29_v11  ;;  %v1358_v11 = vld [vmem:[%s2610_s1 + $0x298] sm:$0xff] }
  0x29   :  { %157 = vmatprep.mubr.f32.mxu0 %v1990_v3  ;;  %1583 = vmatmul.mubr.f32.gmra.mrb[2].mxu1 %v31_v13 }
  0x2a   :  { %1593 = vmatprep.mubr.msk.f32.mxu1 %vm255_vm0, %v2184_v14 }
  0x2c   :  { %158 = vmatmul.mubr.f32.gmra.mrb[4].mxu0 %v30_v12  ;;  %v1837_v12 = vpack.c.bf16 %v1345_v7, %v1342_v6 }
  0x2d   :  { %163 = vmatprep.mubr.f32.mxu0 %v1990_v3 }
  0x30   :  { %164 = vmatmul.mubr.f32.gmra.mrb[6].mxu0 %v31_v13  ;;  %v1341_v13 = vld [vmem:[%s2610_s1 + $0x210] sm:$0xff] }
  0x31   :  { %1607 = vmatprep.mubr.msk.f32.mxu0 %vm255_vm0, %v2191_v15 }
  0xf7   :  { %v147_v16 = vpop.f32.mrb[0].mxu0 }
  0xf8   :  { %v1581_v17 = vpop.f32.mrb[0].mxu1  ;;  %v2195_v18 = vpop.f32.mrb[1].mxu0 }
  0xf9   :  { %v236_v19 = vpop.f32.mrb[1].mxu1 }
  0xfa   :  { %v1817_v20 = vpack.c.bf16 %v1581_v17, %v236_v19  ;;  %v1348_v17 = vld [vmem:[%s2610_s1 + $0x248] sm:$0xff]  ;;  %v1351_v19 = vld [vmem:[%s2610_s1 + $0x260] sm:$0xff] }
  0xfb   :  { %v153_v21 = vpop.f32.mrb[2].mxu0  ;;  %v1841_v22 = vpack.c.bf16 %v1351_v19, %v1348_v17 }
  0xfc   :  { %v1809_v24 = vpack.c.bf16 %v153_v21, %v147_v16  ;;  %1818 = vmatprep.subr.bf16.mxu0 %v1817_v20  ;;  %v2203_v25 = vpop.f32.mrb[3].mxu0  ;;  %v1584_v26 = vpop.f32.mrb[2].mxu1  ;;  %v1344_v16 = vld [vmem:[%s2610_s1 + $0x228] sm:$0xff] }
  0xfd   :  { %1820 = vmatpush3.bf16.msra.mxu0 %v1817_v20  ;;  %v246_v27 = vpop.f32.mrb[3].mxu1  ;;  %v1877_v20 = vpack.c.bf16 %v1358_v11, %v1355_v10  ;;  %v1839_v21 = vpack.c.bf16 %v1344_v16, %v1341_v13 }
  0xfe   :  { %1810 = vmatprep.subr.bf16.mxu1 %v1809_v24  ;;  %v1821_v28 = vpack.c.bf16 %v1584_v26, %v246_v27  ;;  %v1354_v26 = vld [vmem:[%s2610_s1 + $0x278] sm:$0xff]  ;;  %v1357_v27 = vld [vmem:[%s2610_s1 + $0x290] sm:$0xff] }
  0xff   :  { %v159_v30 = vpop.f32.mrb[4].mxu0  ;;  %1812 = vmatpush3.bf16.msra.mxu1 %v1809_v24  ;;  %v1350_v24 = vld [vmem:[%s2610_s1 + $0x258] sm:$0xff] }
 0x100   :  { %v2211_v33 = vpop.f32.mrb[5].mxu0  ;;  %1822 = vmatprep.subr.bf16.mxu0 %v1821_v28 }
 0x101   :  { %1824 = vmatpush3.bf16.msra.mxu0 %v1821_v28  ;;  %v1843_v28 = vpack.c.bf16 %v1350_v24, %v1347_v23 }
 0x102   :  { %1858 = vmatprep.subr.bf16.mxu0 %v1857_v29 }
 0x103   :  { %v165_v39 = vpop.f32.mrb[6].mxu0 }
 0x104   :  { %v1813_v42 = vpack.c.bf16 %v165_v39, %v159_v30  ;;  %v2235_v43 = vpop.f32.mrb[7].mxu0  ;;  %1608 = vmatmul.mubr.msk.f32.vlgmr.msra.gmra.mrb[8].mxu0 %vm255_vm0, %v2216_v34  ;;  %v1353_v30 = vld [vmem:[%s2610_s1 + $0x270] sm:$0xff]  ;;  %v1359_v39 = vld [vmem:[%s2610_s1 + $0x2a0] sm:$0xff] }
 0x105   :  { %1610 = vmatprep.mubr.msk.f32.mxu0 %vm255_vm0, %v2227_v37  ;;  %1860 = vmatpush3.bf16.msra.mxu0 %v1857_v29  ;;  %v1845_v29 = vpack.c.bf16 %v1357_v27, %v1354_v26  ;;  %v1847_v32 = vpack.c.bf16 %v1356_v31, %v1353_v30  ;;  %v1383_v27 = vld [vmem:[%s2610_s1 + $0x310] sm:$0xff] }
 0x106   :  { %1814 = vmatprep.subr.bf16.mxu1 %v1813_v42  ;;  %1862 = vmatprep.subr.bf16.mxu0 %v1861_v38 }
 0x107   :  { %1816 = vmatpush3.bf16.msra.mxu1 %v1813_v42  ;;  %v1851_v42 = vpack.c.bf16 %v1362_v40, %v1359_v39  ;;  %v1389_v39 = vld [vmem:[%s2610_s1 + $0x340] sm:$0xff]  ;;  %v1392_v40 = vld [vmem:[%s2610_s1 + $0x358] sm:$0xff] }
 0x108   :  { %1611 = vmatmul.mubr.msk.f32.gmra.mrb[10].mxu0 %vm255_vm0, %v2250_v47  ;;  %1826 = vmatprep.subr.bf16.mxu1 %v1825_v44  ;;  %v1364_v44 = vld [vmem:[%s2610_s1 + $0x2c8] sm:$0xff] }
 0x109   :  { %1864 = vmatpush3.bf16.msra.mxu0 %v1861_v38  ;;  %v1849_v38 = vpack.c.bf16 %v1363_v36, %v1360_v35  ;;  %v1881_v45 = vpack.c.bf16 %v1364_v44, %v1361_v41  ;;  %v1385_v44 = vld [vmem:[%s2610_s1 + $0x320] sm:$0xff] }
 0x10a   :  { %1594 = vmatmul.mubr.msk.f32.vlgmr.msra.gmra.mrb[4].mxu1 %vm255_vm0, %v2261_v51  ;;  %1866 = vmatprep.subr.bf16.mxu0 %v1865_v50 }
 0x10b   :  { %1596 = vmatprep.mubr.msk.f32.mxu1 %vm255_vm0, %v2272_v55  ;;  %1828 = vmatpush1.bf16.msra.mxu1 %v1827_v52  ;;  %v1368_v52 = vld [vmem:[%s2610_s1 + $0x2e8] sm:$0xff] }
 0x10c   :  { %1830 = vmatprep.subr.bf16.mxu1 %v1829_v56  ;;  %v1370_v56 = vld [vmem:[%s2610_s1 + $0x2f8] sm:$0xff] }
 0x10d   :  { %1868 = vmatpush3.bf16.msra.mxu0 %v1865_v50  ;;  %v1365_v50 = vld [vmem:[%s2610_s1 + $0x2d0] sm:$0xff]  ;;  %v1885_v57 = vpack.c.bf16 %v1370_v56, %v1367_v53  ;;  %v1384_v56 = vld [vmem:[%s2610_s1 + $0x318] sm:$0xff] }
 0x10e   :  { %1597 = vmatmul.mubr.msk.f32.gmra.mrb[6].mxu1 %vm255_vm0, %v2295_v62  ;;  %1870 = vmatprep.subr.bf16.mxu0 %v1869_v61  ;;  %v1855_v54 = vpack.c.bf16 %v1368_v52, %v1365_v50 }
 0x10f   :  { %1832 = vmatpush1.bf16.msra.mxu1 %v1831_v63  ;;  %587 = vmatprep.mubr.f32.mxu1 %v1990_v3 }
 0x110   :  { %1834 = vmatprep.subr.bf16.mxu1 %v1833_v2 }
 0x111   :  { %1872 = vmatpush3.bf16.msra.mxu0 %v1869_v61 }
 0x112   :  { %1874 = vmatprep.subr.bf16.mxu0 %v1873_v8 }
 0x113   :  { %1836 = vmatpush1.bf16.msra.mxu1 %v1835_v9 }
 0x114   :  { %1838 = vmatprep.subr.bf16.mxu1 %v1837_v12 }
 0x115   :  { %1876 = vmatpush3.bf16.msra.mxu0 %v1873_v8 }
 0x116   :  { %1878 = vmatprep.subr.bf16.mxu0 %v1877_v20 }
 0x117   :  { %1840 = vmatpush1.bf16.msra.mxu1 %v1839_v21 }
 0x118   :  { %1842 = vmatprep.subr.bf16.mxu1 %v1841_v22 }
 0x119   :  { %1880 = vmatpush3.bf16.msra.mxu0 %v1877_v20 }
 0x11a   :  { %1882 = vmatprep.subr.bf16.mxu0 %v1881_v45 }
 0x11b   :  { %1844 = vmatpush1.bf16.msra.mxu1 %v1843_v28  ;;  %v1386_v28 = vld [vmem:[%s2610_s1 + $0x328] sm:$0xff] }
 0x11c   :  { %1846 = vmatprep.subr.bf16.mxu1 %v1845_v29  ;;  %v1937_v36 = vpack.c.bf16 %v1386_v28, %v1383_v27  ;;  %v1405_v28 = vld [vmem:[%s2610_s1 + $0x3c0] sm:$0xff] }
 0x11d   :  { %1884 = vmatpush3.bf16.msra.mxu0 %v1881_v45  ;;  %v1941_v45 = vpack.c.bf16 %v1392_v40, %v1389_v39  ;;  %v1414_v39 = vld [vmem:[%s2610_s1 + $0x408] sm:$0xff] }
 0x11e   :  { %1886 = vmatprep.subr.bf16.mxu0 %v1885_v57 }
 0x11f   :  { %1848 = vmatpush1.bf16.msra.mxu1 %v1847_v32 }
 0x120   :  { %1850 = vmatprep.subr.bf16.mxu1 %v1849_v38 }
 0x121   :  { %1888 = vmatpush3.bf16.msra.mxu0 %v1885_v57  ;;  %v1388_v57 = vld [vmem:[%s2610_s1 + $0x338] sm:$0xff] }
 0x123   :  { %1852 = vmatpush1.bf16.msra.mxu1 %v1851_v42  ;;  %v1382_v42 = vld [vmem:[%s2610_s1 + $0x308] sm:$0xff] }
 0x124   :  { %1854 = vmatprep.subr.bf16.mxu1 %v1853_v49  ;;  %v1398_v49 = vld [vmem:[%s2610_s1 + $0x388] sm:$0xff]  ;;  %v1905_v53 = vpack.c.bf16 %v1385_v44, %v1382_v42  ;;  %v1421_v44 = vld [vmem:[%s2610_s1 + $0x440] sm:$0xff] }
 0x125   :  { %v1418_v42 = vld [vmem:[%s2610_s1 + $0x428] sm:$0xff] }
 0x127   :  { %1856 = vmatpush1.bf16.msra.mxu1 %v1855_v54  ;;  %v1381_v54 = vld [vmem:[%s2610_s1 + $0x300] sm:$0xff] }
 0x1d7   :  { %v1609_v58 = vpop.f32.mrb[8].mxu0 }
 0x1d8   :  { %v435_v59 = vpop.f32.mrb[9].mxu0 }
 0x1db   :  { %v1612_v60 = vpop.f32.mrb[10].mxu0 }
 0x1dc   :  { %v445_v61 = vpop.f32.mrb[11].mxu0 }
 0x1dd   :  { %v1595_v63 = vpop.f32.mrb[4].mxu1 }
 0x1de   :  { %v354_v0 = vadd.f32 %v1595_v63, %v2203_v25  ;;  %v334_v1 = vpop.f32.mrb[5].mxu1  ;;  %v1404_v63 = vld [vmem:[%s2610_s1 + $0x3b8] sm:$0xff] }
 0x1df   :  { %v353_v2 = vadd.f32 %v334_v1, %v2195_v18  ;;  %v1387_v1 = vld [vmem:[%s2610_s1 + $0x330] sm:$0xff] }
 0x1e0   :  { %v455_v5 = vadd.f32 %v1609_v58, %v354_v0  ;;  %v1391_v58 = vld [vmem:[%s2610_s1 + $0x350] sm:$0xff] }
 0x1e1   :  { %v454_v6 = vadd.f32 %v435_v59, %v353_v2  ;;  %v1598_v7 = vpop.f32.mrb[6].mxu1  ;;  %v1945_v59 = vpack.c.bf16 %v1398_v49, %v1395_v48  ;;  %v1909_v0 = vpack.c.bf16 %v1391_v58, %v1388_v57  ;;  %v1390_v2 = vld [vmem:[%s2610_s1 + $0x348] sm:$0xff]  ;;  %v1420_v48 = vld [vmem:[%s2610_s1 + $0x438] sm:$0xff]  ;;  %v1419_v49 = vld [vmem:[%s2610_s1 + $0x430] sm:$0xff] }
 0x1e2   :  { %v465_v8 = vadd.f32 %v1322_v4, %v455_v5  ;;  %v356_v9 = vadd.f32 %v1598_v7, %v2235_v43  ;;  %v344_v10 = vpop.f32.mrb[7].mxu1  ;;  %v1397_v5 = vld [vmem:[%s2610_s1 + $0x380] sm:$0xff]  ;;  %v1911_v7 = vpack.c.bf16 %v1390_v2, %v1387_v1  ;;  %v1427_v57 = vld [vmem:[%s2610_s1 + $0x470] sm:$0xff] }
 0x1e3   :  { %v464_v11 = vadd.f32 %v1322_v4, %v454_v6  ;;  %v355_v12 = vadd.f32 %v344_v10, %v2211_v33 }
 0x1e4   :  { %v457_v13 = vadd.f32 %v1612_v60, %v356_v9  ;;  %v469_v17 = vmax.f32 %v465_v8, 0.0  ;;  %v1907_v60 = vpack.c.bf16 %v1384_v56, %v1381_v54  ;;  %v1407_v8 = vld [vmem:[%s2610_s1 + $0x3d0] sm:$0xff]  ;;  %v1410_v9 = vld [vmem:[%s2610_s1 + $0x3e8] sm:$0xff]  ;;  %v1424_v56 = vld [vmem:[%s2610_s1 + $0x458] sm:$0xff] }
 0x1e5   :  { %v468_v16 = vmax.f32 %v464_v11, 0.0  ;;  %v456_v25 = vadd.f32 %v445_v61, %v355_v12  ;;  %v1401_v61 = vld [vmem:[%s2610_s1 + $0x3a0] sm:$0xff]  ;;  %v1396_v12 = vld [vmem:[%s2610_s1 + $0x378] sm:$0xff]  ;;  %v1933_v58 = vpack.c.bf16 %v1427_v57, %v1424_v56 }
 0x1e6   :  { %v467_v19 = vadd.f32 %v1322_v4, %v457_v13  ;;  %v1949_v6 = vpack.c.bf16 %v1404_v63, %v1401_v61  ;;  %v1393_v11 = vld [vmem:[%s2610_s1 + $0x360] sm:$0xff]  ;;  %v1400_v13 = vld [vmem:[%s2610_s1 + $0x398] sm:$0xff] }
 0x1e7   :  { %v466_v18 = vadd.f32 %v1322_v4, %v456_v25  ;;  %588 = vmatmul.mubr.f32.vlgmr.msra.gmra.mrb[8].mxu1 %v468_v16  ;;  %1645 = vmatprep.mubr.f32.mxu0 %v468_v16  ;;  %v1394_v4 = vld [vmem:[%s2610_s1 + $0x368] sm:$0xff]  ;;  %v1403_v16 = vld [vmem:[%s2610_s1 + $0x3b0] sm:$0xff]  ;;  %v1953_v25 = vpack.c.bf16 %v1410_v9, %v1407_v8  ;;  %v1425_v61 = vld [vmem:[%s2610_s1 + $0x460] sm:$0xff] }
 0x1e8   :  { %1646 = vmatmul.mubr.f32.vlgmr.msra.gmra.mrb[12].mxu0 %v469_v17  ;;  %593 = vmatprep.mubr.f32.mxu1 %v1990_v3  ;;  %v471_v21 = vmax.f32 %v467_v19, 0.0  ;;  %v1913_v10 = vpack.c.bf16 %v1397_v5, %v1394_v4  ;;  %v1413_v19 = vld [vmem:[%s2610_s1 + $0x400] sm:$0xff] }
 0x1e9   :  { %v470_v20 = vmax.f32 %v466_v18, 0.0  ;;  %v1416_v18 = vld [vmem:[%s2610_s1 + $0x418] sm:$0xff] }
 0x1eb   :  { %594 = vmatmul.mubr.f32.gmra.mrb[10].mxu1 %v469_v17  ;;  %1648 = vmatprep.mubr.f32.mxu0 %v470_v20  ;;  %v1915_v17 = vpack.c.bf16 %v1396_v12, %v1393_v11  ;;  %v1380_v11 = vld [vmem:[%s2614_s2 + $0x1] ss:$0 sm:$0xff] }
 0x1ec   :  { %1649 = vmatmul.mubr.f32.gmra.mrb[14].mxu0 %v471_v21  ;;  %599 = vmatprep.mubr.f32.mxu1 %v1990_v3 }
 0x1ed   :  { %1659 = vmatprep.mubr.msk.f32.mxu0 %vm255_vm0, %v2184_v14 }
 0x1ef   :  { %600 = vmatmul.mubr.f32.gmra.mrb[12].mxu1 %v470_v20  ;;  %v1917_v20 = vpack.c.bf16 %v1403_v16, %v1400_v13 }
 0x1f0   :  { %605 = vmatprep.mubr.f32.mxu1 %v1990_v3 }
 0x1f3   :  { %606 = vmatmul.mubr.f32.gmra.mrb[14].mxu1 %v471_v21  ;;  %v1399_v21 = vld [vmem:[%s2610_s1 + $0x390] sm:$0xff] }
 0x1f4   :  { %1673 = vmatprep.mubr.msk.f32.mxu1 %vm255_vm0, %v2191_v15 }
 0x2ba   :  { %v589_v33 = vpop.f32.mrb[8].mxu1 }
 0x2bb   :  { %v2404_v43 = vpop.f32.mrb[9].mxu1  ;;  %v1647_v22 = vpop.f32.mrb[12].mxu0 }
 0x2bc   :  { %v678_v23 = vpop.f32.mrb[13].mxu0 }
 0x2bd   :  { %v1897_v24 = vpack.c.bf16 %v1647_v22, %v678_v23  ;;  %v1406_v22 = vld [vmem:[%s2610_s1 + $0x3c8] sm:$0xff]  ;;  %v1409_v23 = vld [vmem:[%s2610_s1 + $0x3e0] sm:$0xff] }
 0x2be   :  { %v595_v26 = vpop.f32.mrb[10].mxu1  ;;  %v1921_v27 = vpack.c.bf16 %v1409_v23, %v1406_v22 }
 0x2bf   :  { %v1889_v29 = vpack.c.bf16 %v595_v26, %v589_v33  ;;  %v2412_v30 = vpop.f32.mrb[11].mxu1  ;;  %v1650_v31 = vpop.f32.mrb[14].mxu0  ;;  %1898 = vmatprep.subr.bf16.mxu1 %v1897_v24  ;;  %v1402_v33 = vld [vmem:[%s2610_s1 + $0x3a8] sm:$0xff] }
 0x2c0   :  { %v688_v32 = vpop.f32.mrb[15].mxu0  ;;  %1900 = vmatpush3.bf16.msra.mxu1 %v1897_v24  ;;  %v1957_v24 = vpack.c.bf16 %v1416_v18, %v1413_v19  ;;  %v1919_v26 = vpack.c.bf16 %v1402_v33, %v1399_v21 }
 0x2c1   :  { %v1901_v35 = vpack.c.bf16 %v1650_v31, %v688_v32  ;;  %1890 = vmatprep.subr.bf16.mxu0 %v1889_v29  ;;  %v1412_v31 = vld [vmem:[%s2610_s1 + $0x3f8] sm:$0xff]  ;;  %v1415_v32 = vld [vmem:[%s2610_s1 + $0x410] sm:$0xff] }
 0x2c2   :  { %v601_v38 = vpop.f32.mrb[12].mxu1  ;;  %1892 = vmatpush3.bf16.msra.mxu0 %v1889_v29  ;;  %v1408_v29 = vld [vmem:[%s2610_s1 + $0x3d8] sm:$0xff] }
 0x2c3   :  { %v2420_v41 = vpop.f32.mrb[13].mxu1  ;;  %1902 = vmatprep.subr.bf16.mxu1 %v1901_v35 }
 0x2c4   :  { %1904 = vmatpush3.bf16.msra.mxu1 %v1901_v35  ;;  %v1923_v35 = vpack.c.bf16 %v1408_v29, %v1405_v28 }
 0x2c5   :  { %1938 = vmatprep.subr.bf16.mxu1 %v1937_v36 }
 0x2c6   :  { %v607_v46 = vpop.f32.mrb[14].mxu1 }
 0x2c7   :  { %v1893_v50 = vpack.c.bf16 %v607_v46, %v601_v38  ;;  %v2434_v52 = vpop.f32.mrb[15].mxu1  ;;  %1674 = vmatmul.mubr.msk.f32.vlgmr.msra.gmra.mrb[16].mxu1 %vm255_vm0, %v2216_v34  ;;  %v1411_v38 = vld [vmem:[%s2610_s1 + $0x3f0] sm:$0xff]  ;;  %v1417_v46 = vld [vmem:[%s2610_s1 + $0x420] sm:$0xff] }
 0x2c8   :  { %1676 = vmatprep.mubr.msk.f32.mxu1 %vm255_vm0, %v2227_v37  ;;  %1940 = vmatpush3.bf16.msra.mxu1 %v1937_v36  ;;  %v1925_v36 = vpack.c.bf16 %v1415_v32, %v1412_v31  ;;  %v1927_v40 = vpack.c.bf16 %v1414_v39, %v1411_v38 }
 0x2c9   :  { %1894 = vmatprep.subr.bf16.mxu0 %v1893_v50  ;;  %1942 = vmatprep.subr.bf16.mxu1 %v1941_v45 }
 0x2ca   :  { %1896 = vmatpush3.bf16.msra.mxu0 %v1893_v50  ;;  %v1931_v50 = vpack.c.bf16 %v1420_v48, %v1417_v46 }
 0x2cb   :  { %1677 = vmatmul.mubr.msk.f32.gmra.mrb[18].mxu1 %vm255_vm0, %v2250_v47  ;;  %1906 = vmatprep.subr.bf16.mxu0 %v1905_v53  ;;  %v1422_v53 = vld [vmem:[%s2610_s1 + $0x448] sm:$0xff] }
 0x2cc   :  { %1944 = vmatpush3.bf16.msra.mxu1 %v1941_v45  ;;  %v1929_v45 = vpack.c.bf16 %v1421_v44, %v1418_v42  ;;  %v1961_v54 = vpack.c.bf16 %v1422_v53, %v1419_v49 }
 0x2cd   :  { %1660 = vmatmul.mubr.msk.f32.vlgmr.msra.gmra.mrb[16].mxu0 %vm255_vm0, %v2261_v51  ;;  %1946 = vmatprep.subr.bf16.mxu1 %v1945_v59 }
 0x2ce   :  { %1662 = vmatprep.mubr.msk.f32.mxu0 %vm255_vm0, %v2272_v55  ;;  %1908 = vmatpush1.bf16.msra.mxu0 %v1907_v60  ;;  %v1426_v60 = vld [vmem:[%s2610_s1 + $0x468] sm:$0xff] }
 0x2cf   :  { %1910 = vmatprep.subr.bf16.mxu0 %v1909_v0  ;;  %v1428_v0 = vld [vmem:[%s2610_s1 + $0x478] sm:$0xff] }
 0x2d0   :  { %1948 = vmatpush3.bf16.msra.mxu1 %v1945_v59  ;;  %v1423_v59 = vld [vmem:[%s2610_s1 + $0x450] sm:$0xff]  ;;  %v1965_v1 = vpack.c.bf16 %v1428_v0, %v1425_v61 }
 0x2d1   :  { %1663 = vmatmul.mubr.msk.f32.gmra.mrb[18].mxu0 %vm255_vm0, %v2295_v62  ;;  %1950 = vmatprep.subr.bf16.mxu1 %v1949_v6  ;;  %v1935_v63 = vpack.c.bf16 %v1426_v60, %v1423_v59 }
 0x2d2   :  { %1912 = vmatpush1.bf16.msra.mxu0 %v1911_v7  ;;  %1004 = vmatprep.mubr.f32.mxu0 %v1990_v3 }
 0x2d3   :  { %1914 = vmatprep.subr.bf16.mxu0 %v1913_v10 }
 0x2d4   :  { %1952 = vmatpush3.bf16.msra.mxu1 %v1949_v6 }
 0x2d5   :  { %1954 = vmatprep.subr.bf16.mxu1 %v1953_v25 }
 0x2d6   :  { %1916 = vmatpush1.bf16.msra.mxu0 %v1915_v17 }
 0x2d7   :  { %1918 = vmatprep.subr.bf16.mxu0 %v1917_v20 }
 0x2d8   :  { %1956 = vmatpush3.bf16.msra.mxu1 %v1953_v25 }
 0x2d9   :  { %1958 = vmatprep.subr.bf16.mxu1 %v1957_v24 }
 0x2da   :  { %1920 = vmatpush1.bf16.msra.mxu0 %v1919_v26 }
 0x2db   :  { %1922 = vmatprep.subr.bf16.mxu0 %v1921_v27 }
 0x2dc   :  { %1960 = vmatpush3.bf16.msra.mxu1 %v1957_v24 }
 0x2dd   :  { %1962 = vmatprep.subr.bf16.mxu1 %v1961_v54 }
 0x2de   :  { %1924 = vmatpush1.bf16.msra.mxu0 %v1923_v35 }
 0x2df   :  { %1926 = vmatprep.subr.bf16.mxu0 %v1925_v36 }
 0x2e0   :  { %1964 = vmatpush3.bf16.msra.mxu1 %v1961_v54 }
 0x2e1   :  { %1966 = vmatprep.subr.bf16.mxu1 %v1965_v1 }
 0x2e2   :  { %1928 = vmatpush1.bf16.msra.mxu0 %v1927_v40 }
 0x2e3   :  { %1930 = vmatprep.subr.bf16.mxu0 %v1929_v45 }
 0x2e4   :  { %1968 = vmatpush3.bf16.msra.mxu1 %v1965_v1 }
 0x2e6   :  { %1932 = vmatpush1.bf16.msra.mxu0 %v1931_v50 }
 0x2e7   :  { %1934 = vmatprep.subr.bf16.mxu0 %v1933_v58 }
 0x2ea   :  { %1936 = vmatpush1.bf16.msra.mxu0 %v1935_v63 }
 0x39a   :  { %v1675_v2 = vpop.f32.mrb[16].mxu1 }
 0x39b   :  { %v852_v4 = vpop.f32.mrb[17].mxu1 }
 0x39e   :  { %v1678_v5 = vpop.f32.mrb[18].mxu1 }
 0x39f   :  { %v862_v6 = vpop.f32.mrb[19].mxu1 }
 0x3a0   :  { %v1661_v7 = vpop.f32.mrb[16].mxu0 }
 0x3a1   :  { %v783_v8 = vadd.f32 %v1661_v7, %v2412_v30  ;;  %v763_v9 = vpop.f32.mrb[17].mxu0 }
 0x3a2   :  { %v782_v10 = vadd.f32 %v763_v9, %v2404_v43 }
 0x3a3   :  { %v872_v12 = vadd.f32 %v1675_v2, %v783_v8 }
 0x3a4   :  { %v871_v13 = vadd.f32 %v852_v4, %v782_v10  ;;  %v1664_v16 = vpop.f32.mrb[18].mxu0 }
 0x3a5   :  { %v882_v25 = vadd.f32 %v1380_v11, %v872_v12  ;;  %v785_v17 = vadd.f32 %v1664_v16, %v2434_v52  ;;  %v773_v19 = vpop.f32.mrb[19].mxu0 }
 0x3a6   :  { %v881_v18 = vadd.f32 %v1380_v11, %v871_v13  ;;  %v784_v20 = vadd.f32 %v773_v19, %v2420_v41 }
 0x3a7   :  { %v874_v21 = vadd.f32 %v1678_v5, %v785_v17  ;;  %v886_v22 = vmax.f32 %v882_v25, 0.0 }
 0x3a8   :  { %v885_v33 = vmax.f32 %v881_v18, 0.0  ;;  %v873_v30 = vadd.f32 %v862_v6, %v784_v20 }
 0x3a9   :  { %v884_v23 = vadd.f32 %v1380_v11, %v874_v21 }
 0x3aa   :  { %v883_v43 = vadd.f32 %v1380_v11, %v873_v30  ;;  %1005 = vmatmul.mubr.f32.vlgmr.msra.gmra.mrb[20].mxu0 %v885_v33  ;;  %1711 = vmatprep.mubr.f32.mxu1 %v885_v33 }
 0x3ab   :  { %1712 = vmatmul.mubr.f32.vlgmr.msra.gmra.mrb[20].mxu1 %v886_v22  ;;  %1010 = vmatprep.mubr.f32.mxu0 %v1990_v3  ;;  %v888_v26 = vmax.f32 %v884_v23, 0.0 }
 0x3ac   :  { %v887_v24 = vmax.f32 %v883_v43, 0.0 }
 0x3ae   :  { %1011 = vmatmul.mubr.f32.gmra.mrb[22].mxu0 %v886_v22  ;;  %1714 = vmatprep.mubr.f32.mxu1 %v887_v24 }
 0x3af   :  { %1715 = vmatmul.mubr.f32.gmra.mrb[22].mxu1 %v888_v26  ;;  %1016 = vmatprep.mubr.f32.mxu0 %v1990_v3 }
 0x3b0   :  { %1725 = vmatprep.mubr.msk.f32.mxu1 %vm255_vm0, %v2184_v14 }
 0x3b2   :  { %1017 = vmatmul.mubr.f32.gmra.mrb[24].mxu0 %v887_v24 }
 0x3b3   :  { %1022 = vmatprep.mubr.f32.mxu0 %v1990_v3 }
 0x3b6   :  { %1023 = vmatmul.mubr.f32.gmra.mrb[26].mxu0 %v888_v26 }
 0x3b7   :  { %1739 = vmatprep.mubr.msk.f32.mxu0 %vm255_vm0, %v2191_v15 }
 0x47d   :  { %v1006_v41 = vpop.f32.mrb[20].mxu0 }
 0x47e   :  { %v1008_v52 = vpop.f32.mrb[21].mxu0  ;;  %v1713_v27 = vpop.f32.mrb[20].mxu1 }
 0x47f   :  { %v1095_v28 = vpop.f32.mrb[21].mxu1 }
 0x480   :  { %v1977_v29 = vpack.c.bf16 %v1713_v27, %v1095_v28 }
 0x481   :  { %v1012_v31 = vpop.f32.mrb[22].mxu0 }
 0x482   :  { %v1969_v32 = vpack.c.bf16 %v1012_v31, %v1006_v41  ;;  %v1014_v35 = vpop.f32.mrb[23].mxu0  ;;  %v1716_v36 = vpop.f32.mrb[22].mxu1  ;;  %1978 = vmatprep.subr.bf16.mxu0 %v1977_v29 }
 0x483   :  { %v1105_v38 = vpop.f32.mrb[23].mxu1  ;;  %1980 = vmatpush3.bf16.msra.mxu0 %v1977_v29 }
 0x484   :  { %v1981_v14 = vpack.c.bf16 %v1716_v36, %v1105_v38  ;;  %1970 = vmatprep.subr.bf16.mxu1 %v1969_v32 }
 0x485   :  { %v1018_v39 = vpop.f32.mrb[24].mxu0  ;;  %1972 = vmatpush3.bf16.msra.mxu1 %v1969_v32 }
 0x486   :  { %v1020_v3 = vpop.f32.mrb[25].mxu0  ;;  %1982 = vmatprep.subr.bf16.mxu0 %v1981_v14 }
 0x487   :  { %1984 = vmatpush3.bf16.msra.mxu0 %v1981_v14 }
 0x489   :  { %v1024_v15 = vpop.f32.mrb[26].mxu0 }
 0x48a   :  { %v1973_v40 = vpack.c.bf16 %v1024_v15, %v1018_v39  ;;  %v1026_v42 = vpop.f32.mrb[27].mxu0  ;;  %1740 = vmatmul.mubr.msk.f32.vlgmr.msra.gmra.mrb[28].mxu0 %vm255_vm0, %v2216_v34 }
 0x48c   :  { %1974 = vmatprep.subr.bf16.mxu1 %v1973_v40 }
 0x48d   :  { %1976 = vmatpush3.bf16.msra.mxu1 %v1973_v40 }
 0x48e   :  { %1985 = vmatprep.subr.bf16.mxu1 %v1977_v29 }
 0x490   :  { %1726 = vmatmul.mubr.msk.f32.vlgmr.msra.gmra.mrb[24].mxu1 %vm255_vm0, %v2261_v51 }
 0x491   :  { %1987 = vmatpush3.bf16.msra.mxu1 %v1977_v29  ;;  %1728 = vmatprep.mubr.msk.f32.mxu1 %vm255_vm0, %v2272_v55  ;;  %v1438_v55 = vld [vmem:[%s2614_s2 + $0x2] ss:$0 sm:$0xff] }
 0x492   :  { %1986 = vmatprep.subr.bf16.mxu1 %v1981_v14 }
 0x494   :  { %1729 = vmatmul.mubr.msk.f32.gmra.mrb[26].mxu1 %vm255_vm0, %v2295_v62 }
 0x495   :  { %1988 = vmatpush3.bf16.msra.mxu1 %v1981_v14  ;;  %1742 = vmatprep.mubr.msk.f32.mxu1 %vm255_vm0, %v2227_v37 }
 0x498   :  { %1743 = vmatmul.mubr.msk.f32.vlgmr.msra.gmra.mrb[28].mxu1 %vm255_vm0, %v2250_v47 }
 0x55d   :  { %v1741_v34 = vpop.f32.mrb[28].mxu0 }
 0x55e   :  { %v1269_v44 = vpop.f32.mrb[29].mxu0 }
 0x563   :  { %v1727_v45 = vpop.f32.mrb[24].mxu1 }
 0x564   :  { %v1200_v46 = vadd.f32 %v1727_v45, %v1014_v35  ;;  %v1180_v51 = vpop.f32.mrb[25].mxu1 }
 0x565   :  { %v1199_v48 = vadd.f32 %v1180_v51, %v1008_v52 }
 0x566   :  { %v1289_v49 = vadd.f32 %v1741_v34, %v1200_v46 }
 0x567   :  { %v1288_v50 = vadd.f32 %v1269_v44, %v1199_v48  ;;  %v1730_v62 = vpop.f32.mrb[26].mxu1 }
 0x568   :  { %v1299_v53 = vadd.f32 %v1438_v55, %v1289_v49  ;;  %v1202_v54 = vadd.f32 %v1730_v62, %v1026_v42  ;;  %v1190_v56 = vpop.f32.mrb[27].mxu1 }
 0x569   :  { %v1298_v37 = vadd.f32 %v1438_v55, %v1288_v50  ;;  %v1201_v57 = vadd.f32 %v1190_v56, %v1020_v3 }
 0x56a   :  { %v1303_v58 = vmax.f32 %v1299_v53, 0.0 }
 0x56b   :  { %v1302_v47 = vmax.f32 %v1298_v37, 0.0  ;;  %v1744_v59 = vpop.f32.mrb[28].mxu1 }
 0x56c   :  { %1307 = vst [vmem:[%s2615_s5 + $0x8] sm:$0xff] %v1303_v58  ;;  %v1291_v60 = vadd.f32 %v1744_v59, %v1202_v54  ;;  %v1279_v61 = vpop.f32.mrb[29].mxu1 }
 0x56d   :  { %1306 = vst [vmem:[%s2615_s5] sm:$0xff] %v1302_v47  ;;  %v1290_v63 = vadd.f32 %v1279_v61, %v1201_v57 }
 0x56e   :  { %v1301_v0 = vadd.f32 %v1438_v55, %v1291_v60 }
 0x56f   :  { %v1300_v1 = vadd.f32 %v1438_v55, %v1290_v63 }
 0x570   :  { %v1305_v2 = vmax.f32 %v1301_v0, 0.0 }
 0x571   :  { %v1304_v4 = vmax.f32 %v1300_v1, 0.0 }
 0x572   :  { %1309 = vst [vmem:[%s2615_s5 + $0x18] sm:$0xff] %v1305_v2 }
 0x573   :  { %1308 = vst [vmem:[%s2615_s5 + $0x10] sm:$0xff] %v1304_v4 }

</bundles_post_ra>
